<compile_context>
chip_gen: v7x
topology: tpu7x:2x2x1
jax: 0.10.0
libtpu: 0.0.40
codegen_flags: <defaults>
</compile_context>

<pallas_src>
import functools

import jax
import jax.numpy as jnp
from jax.experimental import pallas as pl
from jax.experimental.pallas import tpu as pltpu

EPS = 1e-5
KH = 3          # kernel size (3, 1)
PAD = 1         # padding (1, 0)
VMEM_LIMIT = 32 * 1024 * 1024


# ----------------------------- Pallas kernels --------------------------------

def _conv1_subconv_kernel(xe_ref, xo_ref, w_ref, b1_ref, bs_ref,
                          y1e_ref, y1o_ref, s_ref, st_ref, *, w_cols):
    """Fused conv1 (stride 1) + subsampling conv (stride (2,1)).

    xe_ref/xo_ref : (1, 2*Cin, (H/2+1)*W) bf16  even / odd rows of H-padded x
    w_ref         : (2*2*Cout, KH*2*Cin) bf16   [conv1 ; subconv] tap-stacked
    b1_ref/bs_ref : (2*Cout, 1) f32             effective complex biases
    y1e_ref/y1o_ref : (1, 2*Cout, L/2) bf16     conv1 output even / odd rows
    s_ref         : (1, 2*Cout, L/2) f32        subconv output
    st_ref        : (1, 2*Cout, 2) f32          BN1 partials [sum, sum_sq]
    """
    xe = xe_ref[0]                                    # (2*Cin, (H/2+1)*W)
    xo = xo_ref[0]
    l_half = xe.shape[1] - w_cols                     # (H/2)*W output lanes
    two_cout = y1e_ref.shape[1]

    w_all = w_ref[...]                                # (4*Cout, KH*2*Cin)
    w1 = w_all[:two_cout]                             # conv1 weights

    # conv1 even output rows and subconv share one im2col stack:
    #   output row h uses padded rows 2h, 2h+1, 2h+2 -> xe[h], xo[h], xe[h+1]
    stack_a = jnp.concatenate(
        [xe[:, :l_half], xo[:, :l_half], xe[:, w_cols:w_cols + l_half]], axis=0)
    m_a = jnp.dot(w_all, stack_a, preferred_element_type=jnp.float32)
    y1e = m_a[:two_cout] + b1_ref[...]
    s = m_a[two_cout:] + bs_ref[...]

    # conv1 odd output rows: row 2h+1 uses padded rows 2h+1, 2h+2, 2h+3
    #   -> xo[h], xe[h+1], xo[h+1]
    stack_b = jnp.concatenate(
        [xo[:, :l_half], xe[:, w_cols:w_cols + l_half],
         xo[:, w_cols:w_cols + l_half]], axis=0)
    y1o = jnp.dot(w1, stack_b, preferred_element_type=jnp.float32) + b1_ref[...]

    y1e_ref[0] = y1e.astype(y1e_ref.dtype)
    y1o_ref[0] = y1o.astype(y1o_ref.dtype)
    s_ref[0] = s

    # BN1 per-image partial statistics (f32), single combined store.
    ssum = (jnp.sum(y1e, axis=1, keepdims=True)
            + jnp.sum(y1o, axis=1, keepdims=True))
    ssq = (jnp.sum(y1e * y1e, axis=1, keepdims=True)
           + jnp.sum(y1o * y1o, axis=1, keepdims=True))
    st_ref[0] = jnp.concatenate([ssum, ssq], axis=1)


def _bn1_conv2_kernel(y1e_ref, y1o_ref, sc_ref, sh_ref, w_ref, b_ref,
                      y2_ref, st_ref, *, w_cols):
    """BN1 affine + ReLU + conv2 (stride (2,1)); a1 never leaves VMEM.

    y1e_ref/y1o_ref : (1, 2*Cout, L/2) bf16
    sc_ref/sh_ref   : (2*Cout, 1) f32    BN1 scale / shift
    w_ref           : (2*Cout, KH*2*Cout) bf16   tap-stacked conv2 weights
    b_ref           : (2*Cout, 1) f32
    y2_ref          : (1, 2*Cout, L/2) f32
    st_ref          : (1, 2*Cout, 2) f32         BN2 partials [sum, sum_sq]
    """
    sc = sc_ref[...]
    sh = sh_ref[...]
    a1e = jnp.maximum(y1e_ref[0].astype(jnp.float32) * sc + sh, 0.0)
    a1o = jnp.maximum(y1o_ref[0].astype(jnp.float32) * sc + sh, 0.0)
    a1e = a1e.astype(jnp.bfloat16)
    a1o = a1o.astype(jnp.bfloat16)
    c2 = a1o.shape[0]
    l_half = a1o.shape[1]

    # conv2 output row h uses a1-padded rows 2h, 2h+1, 2h+2:
    #   tap0 -> [zero row ; a1_odd[:-1]],  tap1 -> a1_even,  tap2 -> a1_odd
    tap0 = jnp.concatenate(
        [jnp.zeros((c2, w_cols), jnp.bfloat16), a1o[:, :l_half - w_cols]], axis=1)
    stack = jnp.concatenate([tap0, a1e, a1o], axis=0)
    y2 = jnp.dot(w_ref[...], stack, preferred_element_type=jnp.float32) + b_ref[...]

    y2_ref[0] = y2
    ssum = jnp.sum(y2, axis=1, keepdims=True)
    ssq = jnp.sum(y2 * y2, axis=1, keepdims=True)
    st_ref[0] = jnp.concatenate([ssum, ssq], axis=1)


def _bn2_residual_kernel(y2_ref, s_ref, sc_ref, sh_ref, o_ref):
    """out = relu(y2 * scale + shift + s)   (BN2 + residual add + ReLU)."""
    o_ref[0] = jnp.maximum(
        y2_ref[0] * sc_ref[...] + sh_ref[...] + s_ref[0], 0.0)


# ----------------------------- Pallas wrappers --------------------------------

def conv1_subconv(xe, xo, w_all, b1, bs, two_cout, w_cols, l_half):
    n, c2in, l_in = xe.shape
    kern = functools.partial(_conv1_subconv_kernel, w_cols=w_cols)
    plane_in = pl.BlockSpec((1, c2in, l_in), lambda i: (i, 0, 0))
    w_spec = pl.BlockSpec(w_all.shape, lambda i: (0, 0))
    b1_spec = pl.BlockSpec(b1.shape, lambda i: (0, 0))
    bs_spec = pl.BlockSpec(bs.shape, lambda i: (0, 0))
    out_plane = pl.BlockSpec((1, two_cout, l_half), lambda i: (i, 0, 0))
    st_spec = pl.BlockSpec((1, two_cout, 2), lambda i: (i, 0, 0))
    return pl.pallas_call(
        kern,
        grid=(n,),
        in_specs=[plane_in, plane_in, w_spec, b1_spec, bs_spec],
        out_specs=(out_plane, out_plane, out_plane, st_spec),
        out_shape=(jax.ShapeDtypeStruct((n, two_cout, l_half), jnp.bfloat16),
                   jax.ShapeDtypeStruct((n, two_cout, l_half), jnp.bfloat16),
                   jax.ShapeDtypeStruct((n, two_cout, l_half), jnp.float32),
                   jax.ShapeDtypeStruct((n, two_cout, 2), jnp.float32)),
        compiler_params=pltpu.CompilerParams(
            dimension_semantics=("parallel",),
            vmem_limit_bytes=VMEM_LIMIT),
    )(xe, xo, w_all, b1, bs)


def bn1_conv2(y1e, y1o, scale1, shift1, w2, b2, w_cols):
    n, two_cout, l_half = y1e.shape
    kern = functools.partial(_bn1_conv2_kernel, w_cols=w_cols)
    plane = pl.BlockSpec((1, two_cout, l_half), lambda i: (i, 0, 0))
    vec = pl.BlockSpec((two_cout, 1), lambda i: (0, 0))
    w_spec = pl.BlockSpec(w2.shape, lambda i: (0, 0))
    st_spec = pl.BlockSpec((1, two_cout, 2), lambda i: (i, 0, 0))
    return pl.pallas_call(
        kern,
        grid=(n,),
        in_specs=[plane, plane, vec, vec, w_spec, vec],
        out_specs=(plane, st_spec),
        out_shape=(jax.ShapeDtypeStruct((n, two_cout, l_half), jnp.float32),
                   jax.ShapeDtypeStruct((n, two_cout, 2), jnp.float32)),
        compiler_params=pltpu.CompilerParams(
            dimension_semantics=("parallel",),
            vmem_limit_bytes=VMEM_LIMIT),
    )(y1e, y1o, scale1, shift1, w2, b2)


def bn2_residual(y2, s, scale2, shift2):
    n, two_cout, l_half = y2.shape
    plane = pl.BlockSpec((1, two_cout, l_half), lambda i: (i, 0, 0))
    vec = pl.BlockSpec((two_cout, 1), lambda i: (0, 0))
    return pl.pallas_call(
        _bn2_residual_kernel,
        grid=(n,),
        in_specs=[plane, plane, vec, vec],
        out_specs=plane,
        out_shape=jax.ShapeDtypeStruct((n, two_cout, l_half), jnp.float32),
        compiler_params=pltpu.CompilerParams(
            dimension_semantics=("parallel",),
            vmem_limit_bytes=VMEM_LIMIT),
    )(y2, s, scale2, shift2)


# ----------------------------- XLA glue ---------------------------------------

def _pack_complex_weights(wr, wi, br, bi):
    """(Cout, Cin, KH, 1) complex-conv weights -> tap-stacked block matrix.

    Returns w (2*Cout, KH*2*Cin) bf16 with contraction blocks ordered
    tap0|tap1|tap2, each block [[Wr, -Wi], [Wi, Wr]], and the effective bias
    (2*Cout, 1) f32: real bias = br - bi, imag bias = br + bi.
    """
    blocks = []
    for k in range(KH):
        wrk = wr[:, :, k, 0]
        wik = wi[:, :, k, 0]
        top = jnp.concatenate([wrk, -wik], axis=1)     # yr = Wr xr - Wi xi
        bot = jnp.concatenate([wik, wrk], axis=1)      # yi = Wi xr + Wr xi
        blocks.append(jnp.concatenate([top, bot], axis=0))
    w_stk = jnp.concatenate(blocks, axis=1)            # (2*Cout, KH*2*Cin)
    b_eff = jnp.concatenate([br - bi, br + bi])[:, None]
    return w_stk.astype(jnp.bfloat16), b_eff


def _split_even_odd_padded(x0):
    """(N, 2*Cin, H, W) -> even/odd rows of the H-padded input as bf16 planes.

    Padded rows p_0..p_{H+1} (p_0 = p_{H+1} = 0, p_{j+1} = x row j):
      even plane row m = p_{2m}   = [0, x_1, x_3, ...]   -> H/2 + 1 rows
      odd  plane row m = p_{2m+1} = [x_0, x_2, ..., 0]   -> H/2 + 1 rows
    """
    n, c2, _, w = x0.shape
    zero = jnp.zeros((n, c2, 1, w), x0.dtype)
    xe = jnp.concatenate([zero, x0[:, :, 1::2, :]], axis=2)
    xo = jnp.concatenate([x0[:, :, 0::2, :], zero], axis=2)
    to_plane = lambda t: t.reshape(n, c2, -1).astype(jnp.bfloat16)
    return to_plane(xe), to_plane(xo)


def _bn_scale_shift(stats, gamma2, beta2, count):
    """Reduce per-image [sum, sum_sq] partials into per-channel scale/shift."""
    tot = jnp.sum(stats, axis=0)                        # (2*C, 2)
    mean = tot[:, 0] / count
    var = jnp.maximum(tot[:, 1] / count - mean * mean, 0.0)   # biased (train)
    scale = gamma2 * jax.lax.rsqrt(var + EPS)
    shift = beta2 - mean * scale
    return scale[:, None], shift[:, None]


# ----------------------------- Module forward ---------------------------------

def complex_resnet_block_forward(x, params):
    """x: (N, C_in, H, W, 2) -> (N, C_out, H/2, W, 2)   (act_fn = ReLU)."""
    n, c_in, h, w, _ = x.shape
    assert h % 2 == 0, "stride-(2,1) block expects even H"
    c_out = params['conv1'][0].shape[0]
    two_cout = 2 * c_out
    h_half = h // 2
    l_half = h_half * w

    # channel-major planes, real/imag stacked on channels
    x0 = jnp.concatenate([x[..., 0], x[..., 1]], axis=1)       # (N, 2*Cin, H, W)
    xe, xo = _split_even_odd_padded(x0)                        # bf16 planes

    # --- conv1 (stride 1) + subnet conv (stride (2,1)) fused, BN1 partials ---
    w1, b1 = _pack_complex_weights(*params['conv1'])
    ws, bs = _pack_complex_weights(*params['subconv'])
    w1s = jnp.concatenate([w1, ws], axis=0)                    # (4*Cout, KH*2*Cin)
    y1e, y1o, s, st1 = conv1_subconv(xe, xo, w1s, b1, bs, two_cout, w, l_half)

    g1r, be1r, g1i, be1i = params['bn1']
    scale1, shift1 = _bn_scale_shift(
        st1, jnp.concatenate([g1r, g1i]), jnp.concatenate([be1r, be1i]),
        count=n * h * w)

    # --- BN1 + ReLU + conv2 (stride (2,1)) fused, BN2 partials ----------------
    w2, b2 = _pack_complex_weights(*params['conv2'])
    y2, st2 = bn1_conv2(y1e, y1o, scale1, shift1, w2, b2, w)

    g2r, be2r, g2i, be2i = params['bn2']
    scale2, shift2 = _bn_scale_shift(
        st2, jnp.concatenate([g2r, g2i]), jnp.concatenate([be2r, be2i]),
        count=n * h_half * w)

    # --- BN2 + residual add + ReLU, fused ------------------------------------
    out = bn2_residual(y2, s, scale2, shift2)                  # (N, 2*Cout, L/2)

    out4 = out.reshape(n, two_cout, h_half, w)
    return jnp.stack([out4[:, :c_out], out4[:, c_out:]], axis=-1)


# ----------------------------- pure-JAX reference ------------------------------

def _ref_conv(x, wt, stride_h):
    return jax.lax.conv_general_dilated(
        x, wt, window_strides=(stride_h, 1),
        padding=((PAD, PAD), (0, 0)),
        dimension_numbers=('NCHW', 'OIHW', 'NCHW'),
        precision=jax.lax.Precision.HIGHEST)


def _ref_complex_conv(xr, xi, wr, wi, br, bi, stride_h):
    conv_r = lambda t: _ref_conv(t, wr, stride_h) + br[None, :, None, None]
    conv_i = lambda t: _ref_conv(t, wi, stride_h) + bi[None, :, None, None]
    yr = conv_r(xr) - conv_i(xi)
    yi = conv_r(xi) + conv_i(xr)
    return yr, yi


def _ref_bn(y, g, b):
    mean = jnp.mean(y, axis=(0, 2, 3), keepdims=True)
    var = jnp.mean((y - mean) ** 2, axis=(0, 2, 3), keepdims=True)
    return ((y - mean) * jax.lax.rsqrt(var + EPS) * g[None, :, None, None]
            + b[None, :, None, None])


def ref_forward(x, params):
    xr, xi = x[..., 0], x[..., 1]
    y1r, y1i = _ref_complex_conv(xr, xi, *params['conv1'], 1)
    g1r, be1r, g1i, be1i = params['bn1']
    a1r = jnp.maximum(_ref_bn(y1r, g1r, be1r), 0.0)
    a1i = jnp.maximum(_ref_bn(y1i, g1i, be1i), 0.0)
    y2r, y2i = _ref_complex_conv(a1r, a1i, *params['conv2'], 2)
    g2r, be2r, g2i, be2i = params['bn2']
    zr = _ref_bn(y2r, g2r, be2r)
    zi = _ref_bn(y2i, g2i, be2i)
    sr, si = _ref_complex_conv(xr, xi, *params['subconv'], 2)
    outr = jnp.maximum(sr + zr, 0.0)
    outi = jnp.maximum(si + zi, 0.0)
    return jnp.stack([outr, outi], axis=-1)


# ----------------------------- param init --------------------------------------

def init_params(key, c_in, c_out):
    keys = jax.random.split(key, 5)

    def conv_params(k, ci, co):
        k1, k2, k3, k4 = jax.random.split(k, 4)
        wr = 0.2 * jax.random.normal(k1, (co, ci, KH, 1), jnp.float32)
        wi = 0.2 * jax.random.normal(k2, (co, ci, KH, 1), jnp.float32)
        br = 0.1 * jax.random.normal(k3, (co,), jnp.float32)
        bi = 0.1 * jax.random.normal(k4, (co,), jnp.float32)
        return (wr, wi, br, bi)

    def bn_params(k, co):
        k1, k2, k3, k4 = jax.random.split(k, 4)
        gr = 1.0 + 0.1 * jax.random.normal(k1, (co,), jnp.float32)
        br = 0.1 * jax.random.normal(k2, (co,), jnp.float32)
        gi = 1.0 + 0.1 * jax.random.normal(k3, (co,), jnp.float32)
        bi = 0.1 * jax.random.normal(k4, (co,), jnp.float32)
        return (gr, br, gi, bi)

    return {
        'conv1': conv_params(keys[0], c_in, c_out),
        'bn1': bn_params(keys[1], c_out),
        'conv2': conv_params(keys[2], c_out, c_out),
        'bn2': bn_params(keys[3], c_out),
        'subconv': conv_params(keys[4], c_in, c_out),
    }


# ----------------------------- main ---------------------------------------------

if __name__ == "__main__":
    key = jax.random.PRNGKey(0)
    kx, kp = jax.random.split(key)

    N, C_IN, C_OUT, H, W = 2, 4, 8, 16, 16
    x = jax.random.normal(kx, (N, C_IN, H, W, 2), jnp.float32)
    params = init_params(kp, C_IN, C_OUT)

    out = jax.jit(complex_resnet_block_forward)(x, params)
    out = jax.block_until_ready(out)

    ref = ref_forward(x, params)
    assert out.shape == (N, C_OUT, H // 2, W, 2), out.shape
    err = float(jnp.max(jnp.abs(out - ref)))
    # bf16 matmul operands / bf16 y1 intermediate -> slightly relaxed check.
    assert jnp.allclose(out, ref, atol=2e-2, rtol=2e-2), err

    print("KERNEL_OK")
</pallas_src>

<mosaic_0001>
module attributes {stable_mosaic.version = 11 : i64} {
  func.func @_conv1_subconv_kernel(%arg0: i32, %arg1: memref<1x8x144xbf16, #tpu.memory_space<vmem>>, %arg2: memref<1x8x144xbf16, #tpu.memory_space<vmem>>, %arg3: memref<32x24xbf16, #tpu.memory_space<vmem>>, %arg4: memref<16x1xf32, #tpu.memory_space<vmem>>, %arg5: memref<16x1xf32, #tpu.memory_space<vmem>>, %arg6: memref<1x16x128xbf16, #tpu.memory_space<vmem>>, %arg7: memref<1x16x128xbf16, #tpu.memory_space<vmem>>, %arg8: memref<1x16x128xf32, #tpu.memory_space<vmem>>, %arg9: memref<1x16x2xf32, #tpu.memory_space<vmem>>) attributes {dimension_semantics = [#tpu.dimension_semantics<parallel>], iteration_bounds = array<i64: 2>, scalar_prefetch = 0 : i64, scratch_operands = 0 : i64, tpu.core_type = #tpu.core_type<tc>, window_params = [{transform_indices = @transform_0, window_bounds = array<i64: 1, 8, 144>}, {transform_indices = @transform_1, window_bounds = array<i64: 1, 8, 144>}, {pipeline_mode = #tpu.pipeline_mode<synchronous>, transform_indices = @transform_2, window_bounds = array<i64: 32, 24>}, {pipeline_mode = #tpu.pipeline_mode<synchronous>, transform_indices = @transform_3, window_bounds = array<i64: 16, 1>}, {pipeline_mode = #tpu.pipeline_mode<synchronous>, transform_indices = @transform_4, window_bounds = array<i64: 16, 1>}, {transform_indices = @transform_5, window_bounds = array<i64: 1, 16, 128>}, {transform_indices = @transform_6, window_bounds = array<i64: 1, 16, 128>}, {transform_indices = @transform_7, window_bounds = array<i64: 1, 16, 128>}, {transform_indices = @transform_8, window_bounds = array<i64: 1, 16, 2>}]} {
    %c0 = arith.constant 0 : index
    %c0_0 = arith.constant 0 : index
    %c0_1 = arith.constant 0 : index
    %0 = vector.load %arg1[%c0, %c0_0, %c0_1] : memref<1x8x144xbf16, #tpu.memory_space<vmem>>, vector<1x8x144xbf16>
    %1 = vector.shape_cast %0 : vector<1x8x144xbf16> to vector<8x144xbf16>
    %c0_2 = arith.constant 0 : index
    %c0_3 = arith.constant 0 : index
    %c0_4 = arith.constant 0 : index
    %2 = vector.load %arg2[%c0_2, %c0_3, %c0_4] : memref<1x8x144xbf16, #tpu.memory_space<vmem>>, vector<1x8x144xbf16>
    %3 = vector.shape_cast %2 : vector<1x8x144xbf16> to vector<8x144xbf16>
    %c0_5 = arith.constant 0 : index
    %c0_6 = arith.constant 0 : index
    %4 = vector.load %arg3[%c0_5, %c0_6] : memref<32x24xbf16, #tpu.memory_space<vmem>>, vector<32x24xbf16>
    %5 = vector.extract_strided_slice %4 {offsets = [0, 0], sizes = [16, 24], strides = [1, 1]} : vector<32x24xbf16> to vector<16x24xbf16>
    %6 = vector.extract_strided_slice %1 {offsets = [0, 0], sizes = [8, 128], strides = [1, 1]} : vector<8x144xbf16> to vector<8x128xbf16>
    %7 = vector.extract_strided_slice %3 {offsets = [0, 0], sizes = [8, 128], strides = [1, 1]} : vector<8x144xbf16> to vector<8x128xbf16>
    %8 = vector.extract_strided_slice %1 {offsets = [0, 16], sizes = [8, 128], strides = [1, 1]} : vector<8x144xbf16> to vector<8x128xbf16>
    %9 = tpu.concatenate %6, %7, %8 in 0 : vector<8x128xbf16>, vector<8x128xbf16>, vector<8x128xbf16> -> vector<24x128xbf16>
    %cst = arith.constant dense<0.000000e+00> : vector<32x128xf32>
    %10 = tpu.matmul %4, %9, %cst {dimension_numbers = #tpu.dot_dimension_numbers<[1], [0], [0], [1], [0, 0, 1, 1], [], []>} : vector<32x24xbf16>, vector<24x128xbf16>, vector<32x128xf32> -> vector<32x128xf32>
    %11 = vector.extract_strided_slice %10 {offsets = [0, 0], sizes = [16, 128], strides = [1, 1]} : vector<32x128xf32> to vector<16x128xf32>
    %c0_7 = arith.constant 0 : index
    %c0_8 = arith.constant 0 : index
    %12 = vector.load %arg4[%c0_7, %c0_8] : memref<16x1xf32, #tpu.memory_space<vmem>>, vector<16x1xf32>
    %13 = vector.broadcast %12 : vector<16x1xf32> to vector<16x128xf32>
    %14 = arith.addf %11, %13 : vector<16x128xf32>
    %15 = vector.extract_strided_slice %10 {offsets = [16, 0], sizes = [16, 128], strides = [1, 1]} : vector<32x128xf32> to vector<16x128xf32>
    %c0_9 = arith.constant 0 : index
    %c0_10 = arith.constant 0 : index
    %16 = vector.load %arg5[%c0_9, %c0_10] : memref<16x1xf32, #tpu.memory_space<vmem>>, vector<16x1xf32>
    %17 = vector.broadcast %16 : vector<16x1xf32> to vector<16x128xf32>
    %18 = arith.addf %15, %17 : vector<16x128xf32>
    %19 = vector.extract_strided_slice %3 {offsets = [0, 0], sizes = [8, 128], strides = [1, 1]} : vector<8x144xbf16> to vector<8x128xbf16>
    %20 = vector.extract_strided_slice %1 {offsets = [0, 16], sizes = [8, 128], strides = [1, 1]} : vector<8x144xbf16> to vector<8x128xbf16>
    %21 = vector.extract_strided_slice %3 {offsets = [0, 16], sizes = [8, 128], strides = [1, 1]} : vector<8x144xbf16> to vector<8x128xbf16>
    %22 = tpu.concatenate %19, %20, %21 in 0 : vector<8x128xbf16>, vector<8x128xbf16>, vector<8x128xbf16> -> vector<24x128xbf16>
    %cst_11 = arith.constant dense<0.000000e+00> : vector<16x128xf32>
    %23 = tpu.matmul %5, %22, %cst_11 {dimension_numbers = #tpu.dot_dimension_numbers<[1], [0], [0], [1], [0, 0, 1, 1], [], []>} : vector<16x24xbf16>, vector<24x128xbf16>, vector<16x128xf32> -> vector<16x128xf32>
    %c0_12 = arith.constant 0 : index
    %c0_13 = arith.constant 0 : index
    %24 = vector.load %arg4[%c0_12, %c0_13] : memref<16x1xf32, #tpu.memory_space<vmem>>, vector<16x1xf32>
    %25 = vector.broadcast %24 : vector<16x1xf32> to vector<16x128xf32>
    %26 = arith.addf %23, %25 : vector<16x128xf32>
    %27 = arith.truncf %14 : vector<16x128xf32> to vector<16x128xbf16>
    %c0_14 = arith.constant 0 : index
    %c0_15 = arith.constant 0 : index
    %c0_16 = arith.constant 0 : index
    %28 = vector.load %arg6[%c0_14, %c0_15, %c0_16] : memref<1x16x128xbf16, #tpu.memory_space<vmem>>, vector<1x16x128xbf16>
    %29 = vector.shape_cast %28 : vector<1x16x128xbf16> to vector<16x128xbf16>
    %30 = vector.shape_cast %27 : vector<16x128xbf16> to vector<1x16x128xbf16>
    tpu.vector_store %arg6[%c0_14, %c0_15, %c0_16], %30 {strides = array<i32>} : memref<1x16x128xbf16, #tpu.memory_space<vmem>>, vector<1x16x128xbf16>,
    %31 = arith.truncf %26 : vector<16x128xf32> to vector<16x128xbf16>
    %c0_17 = arith.constant 0 : index
    %c0_18 = arith.constant 0 : index
    %c0_19 = arith.constant 0 : index
    %32 = vector.load %arg7[%c0_17, %c0_18, %c0_19] : memref<1x16x128xbf16, #tpu.memory_space<vmem>>, vector<1x16x128xbf16>
    %33 = vector.shape_cast %32 : vector<1x16x128xbf16> to vector<16x128xbf16>
    %34 = vector.shape_cast %31 : vector<16x128xbf16> to vector<1x16x128xbf16>
    tpu.vector_store %arg7[%c0_17, %c0_18, %c0_19], %34 {strides = array<i32>} : memref<1x16x128xbf16, #tpu.memory_space<vmem>>, vector<1x16x128xbf16>,
    %c0_20 = arith.constant 0 : index
    %c0_21 = arith.constant 0 : index
    %c0_22 = arith.constant 0 : index
    %35 = vector.load %arg8[%c0_20, %c0_21, %c0_22] : memref<1x16x128xf32, #tpu.memory_space<vmem>>, vector<1x16x128xf32>
    %36 = vector.shape_cast %35 : vector<1x16x128xf32> to vector<16x128xf32>
    %37 = vector.shape_cast %18 : vector<16x128xf32> to vector<1x16x128xf32>
    tpu.vector_store %arg8[%c0_20, %c0_21, %c0_22], %37 {strides = array<i32>} : memref<1x16x128xf32, #tpu.memory_space<vmem>>, vector<1x16x128xf32>,
    %cst_23 = arith.constant dense<0.000000e+00> : vector<16xf32>
    %38 = vector.multi_reduction <add>, %14, %cst_23 [1] : vector<16x128xf32> to vector<16xf32>
    %39 = vector.shape_cast %38 : vector<16xf32> to vector<16x1xf32>
    %cst_24 = arith.constant dense<0.000000e+00> : vector<16xf32>
    %40 = vector.multi_reduction <add>, %26, %cst_24 [1] : vector<16x128xf32> to vector<16xf32>
    %41 = vector.shape_cast %40 : vector<16xf32> to vector<16x1xf32>
    %42 = arith.addf %39, %41 : vector<16x1xf32>
    %43 = arith.mulf %14, %14 : vector<16x128xf32>
    %cst_25 = arith.constant dense<0.000000e+00> : vector<16xf32>
    %44 = vector.multi_reduction <add>, %43, %cst_25 [1] : vector<16x128xf32> to vector<16xf32>
    %45 = vector.shape_cast %44 : vector<16xf32> to vector<16x1xf32>
    %46 = arith.mulf %26, %26 : vector<16x128xf32>
    %cst_26 = arith.constant dense<0.000000e+00> : vector<16xf32>
    %47 = vector.multi_reduction <add>, %46, %cst_26 [1] : vector<16x128xf32> to vector<16xf32>
    %48 = vector.shape_cast %47 : vector<16xf32> to vector<16x1xf32>
    %49 = arith.addf %45, %48 : vector<16x1xf32>
    %50 = tpu.concatenate %42, %49 in 1 : vector<16x1xf32>, vector<16x1xf32> -> vector<16x2xf32>
    %c0_27 = arith.constant 0 : index
    %c0_28 = arith.constant 0 : index
    %c0_29 = arith.constant 0 : index
    %51 = vector.load %arg9[%c0_27, %c0_28, %c0_29] : memref<1x16x2xf32, #tpu.memory_space<vmem>>, vector<1x16x2xf32>
    %52 = vector.shape_cast %51 : vector<1x16x2xf32> to vector<16x2xf32>
    %53 = vector.shape_cast %50 : vector<16x2xf32> to vector<1x16x2xf32>
    tpu.vector_store %arg9[%c0_27, %c0_28, %c0_29], %53 {strides = array<i32>} : memref<1x16x2xf32, #tpu.memory_space<vmem>>, vector<1x16x2xf32>,
    return
  }
  func.func @transform_0(%arg0: i32) -> (i32, i32, i32) {
    %c0_i32 = arith.constant 0 : i32
    %c0_i32_0 = arith.constant 0 : i32
    %c0_i32_1 = arith.constant 0 : i32
    return %arg0, %c0_i32, %c0_i32_0 : i32, i32, i32
  }
  func.func @transform_1(%arg0: i32) -> (i32, i32, i32) {
    %c0_i32 = arith.constant 0 : i32
    %c0_i32_0 = arith.constant 0 : i32
    %c0_i32_1 = arith.constant 0 : i32
    return %arg0, %c0_i32, %c0_i32_0 : i32, i32, i32
  }
  func.func @transform_2(%arg0: i32) -> (i32, i32) {
    %c0_i32 = arith.constant 0 : i32
    %c0_i32_0 = arith.constant 0 : i32
    %c0_i32_1 = arith.constant 0 : i32
    return %c0_i32, %c0_i32_0 : i32, i32
  }
  func.func @transform_3(%arg0: i32) -> (i32, i32) {
    %c0_i32 = arith.constant 0 : i32
    %c0_i32_0 = arith.constant 0 : i32
    %c0_i32_1 = arith.constant 0 : i32
    return %c0_i32, %c0_i32_0 : i32, i32
  }
  func.func @transform_4(%arg0: i32) -> (i32, i32) {
    %c0_i32 = arith.constant 0 : i32
    %c0_i32_0 = arith.constant 0 : i32
    %c0_i32_1 = arith.constant 0 : i32
    return %c0_i32, %c0_i32_0 : i32, i32
  }
  func.func @transform_5(%arg0: i32) -> (i32, i32, i32) {
    %c0_i32 = arith.constant 0 : i32
    %c0_i32_0 = arith.constant 0 : i32
    %c0_i32_1 = arith.constant 0 : i32
    return %arg0, %c0_i32, %c0_i32_0 : i32, i32, i32
  }
  func.func @transform_6(%arg0: i32) -> (i32, i32, i32) {
    %c0_i32 = arith.constant 0 : i32
    %c0_i32_0 = arith.constant 0 : i32
    %c0_i32_1 = arith.constant 0 : i32
    return %arg0, %c0_i32, %c0_i32_0 : i32, i32, i32
  }
  func.func @transform_7(%arg0: i32) -> (i32, i32, i32) {
    %c0_i32 = arith.constant 0 : i32
    %c0_i32_0 = arith.constant 0 : i32
    %c0_i32_1 = arith.constant 0 : i32
    return %arg0, %c0_i32, %c0_i32_0 : i32, i32, i32
  }
  func.func @transform_8(%arg0: i32) -> (i32, i32, i32) {
    %c0_i32 = arith.constant 0 : i32
    %c0_i32_0 = arith.constant 0 : i32
    %c0_i32_1 = arith.constant 0 : i32
    return %arg0, %c0_i32, %c0_i32_0 : i32, i32, i32
  }
}

module attributes {stable_mosaic.version = 11 : i64} {
  func.func @_bn1_conv2_kernel(%arg0: i32, %arg1: memref<1x16x128xbf16, #tpu.memory_space<vmem>>, %arg2: memref<1x16x128xbf16, #tpu.memory_space<vmem>>, %arg3: memref<16x1xf32, #tpu.memory_space<vmem>>, %arg4: memref<16x1xf32, #tpu.memory_space<vmem>>, %arg5: memref<16x48xbf16, #tpu.memory_space<vmem>>, %arg6: memref<16x1xf32, #tpu.memory_space<vmem>>, %arg7: memref<1x16x128xf32, #tpu.memory_space<vmem>>, %arg8: memref<1x16x2xf32, #tpu.memory_space<vmem>>) attributes {dimension_semantics = [#tpu.dimension_semantics<parallel>], iteration_bounds = array<i64: 2>, scalar_prefetch = 0 : i64, scratch_operands = 0 : i64, tpu.core_type = #tpu.core_type<tc>, window_params = [{transform_indices = @transform_0, window_bounds = array<i64: 1, 16, 128>}, {transform_indices = @transform_1, window_bounds = array<i64: 1, 16, 128>}, {pipeline_mode = #tpu.pipeline_mode<synchronous>, transform_indices = @transform_2, window_bounds = array<i64: 16, 1>}, {pipeline_mode = #tpu.pipeline_mode<synchronous>, transform_indices = @transform_3, window_bounds = array<i64: 16, 1>}, {pipeline_mode = #tpu.pipeline_mode<synchronous>, transform_indices = @transform_4, window_bounds = array<i64: 16, 48>}, {pipeline_mode = #tpu.pipeline_mode<synchronous>, transform_indices = @transform_5, window_bounds = array<i64: 16, 1>}, {transform_indices = @transform_6, window_bounds = array<i64: 1, 16, 128>}, {transform_indices = @transform_7, window_bounds = array<i64: 1, 16, 2>}]} {
    %c0 = arith.constant 0 : index
    %c0_0 = arith.constant 0 : index
    %0 = vector.load %arg3[%c0, %c0_0] : memref<16x1xf32, #tpu.memory_space<vmem>>, vector<16x1xf32>
    %c0_1 = arith.constant 0 : index
    %c0_2 = arith.constant 0 : index
    %1 = vector.load %arg4[%c0_1, %c0_2] : memref<16x1xf32, #tpu.memory_space<vmem>>, vector<16x1xf32>
    %c0_3 = arith.constant 0 : index
    %c0_4 = arith.constant 0 : index
    %c0_5 = arith.constant 0 : index
    %2 = vector.load %arg1[%c0_3, %c0_4, %c0_5] : memref<1x16x128xbf16, #tpu.memory_space<vmem>>, vector<1x16x128xbf16>
    %3 = vector.shape_cast %2 : vector<1x16x128xbf16> to vector<16x128xbf16>
    %4 = arith.extf %3 : vector<16x128xbf16> to vector<16x128xf32>
    %5 = vector.broadcast %0 : vector<16x1xf32> to vector<16x128xf32>
    %6 = arith.mulf %4, %5 : vector<16x128xf32>
    %7 = vector.broadcast %1 : vector<16x1xf32> to vector<16x128xf32>
    %8 = arith.addf %6, %7 : vector<16x128xf32>
    %cst = arith.constant 0.000000e+00 : f32
    %9 = vector.broadcast %cst : f32 to vector<16x128xf32>
    %10 = arith.maximumf %8, %9 : vector<16x128xf32>
    %c0_6 = arith.constant 0 : index
    %c0_7 = arith.constant 0 : index
    %c0_8 = arith.constant 0 : index
    %11 = vector.load %arg2[%c0_6, %c0_7, %c0_8] : memref<1x16x128xbf16, #tpu.memory_space<vmem>>, vector<1x16x128xbf16>
    %12 = vector.shape_cast %11 : vector<1x16x128xbf16> to vector<16x128xbf16>
    %13 = arith.extf %12 : vector<16x128xbf16> to vector<16x128xf32>
    %14 = vector.broadcast %0 : vector<16x1xf32> to vector<16x128xf32>
    %15 = arith.mulf %13, %14 : vector<16x128xf32>
    %16 = vector.broadcast %1 : vector<16x1xf32> to vector<16x128xf32>
    %17 = arith.addf %15, %16 : vector<16x128xf32>
    %cst_9 = arith.constant 0.000000e+00 : f32
    %18 = vector.broadcast %cst_9 : f32 to vector<16x128xf32>
    %19 = arith.maximumf %17, %18 : vector<16x128xf32>
    %20 = arith.truncf %10 : vector<16x128xf32> to vector<16x128xbf16>
    %21 = arith.truncf %19 : vector<16x128xf32> to vector<16x128xbf16>
    %cst_10 = arith.constant 0.000000e+00 : bf16
    %22 = vector.broadcast %cst_10 : bf16 to vector<16x16xbf16>
    %23 = vector.extract_strided_slice %21 {offsets = [0, 0], sizes = [16, 112], strides = [1, 1]} : vector<16x128xbf16> to vector<16x112xbf16>
    %24 = tpu.concatenate %22, %23 in 1 : vector<16x16xbf16>, vector<16x112xbf16> -> vector<16x128xbf16>
    %25 = tpu.concatenate %24, %20, %21 in 0 : vector<16x128xbf16>, vector<16x128xbf16>, vector<16x128xbf16> -> vector<48x128xbf16>
    %c0_11 = arith.constant 0 : index
    %c0_12 = arith.constant 0 : index
    %26 = vector.load %arg5[%c0_11, %c0_12] : memref<16x48xbf16, #tpu.memory_space<vmem>>, vector<16x48xbf16>
    %cst_13 = arith.constant dense<0.000000e+00> : vector<16x128xf32>
    %27 = tpu.matmul %26, %25, %cst_13 {dimension_numbers = #tpu.dot_dimension_numbers<[1], [0], [0], [1], [0, 0, 1, 1], [], []>} : vector<16x48xbf16>, vector<48x128xbf16>, vector<16x128xf32> -> vector<16x128xf32>
    %c0_14 = arith.constant 0 : index
    %c0_15 = arith.constant 0 : index
    %28 = vector.load %arg6[%c0_14, %c0_15] : memref<16x1xf32, #tpu.memory_space<vmem>>, vector<16x1xf32>
    %29 = vector.broadcast %28 : vector<16x1xf32> to vector<16x128xf32>
    %30 = arith.addf %27, %29 : vector<16x128xf32>
    %c0_16 = arith.constant 0 : index
    %c0_17 = arith.constant 0 : index
    %c0_18 = arith.constant 0 : index
    %31 = vector.load %arg7[%c0_16, %c0_17, %c0_18] : memref<1x16x128xf32, #tpu.memory_space<vmem>>, vector<1x16x128xf32>
    %32 = vector.shape_cast %31 : vector<1x16x128xf32> to vector<16x128xf32>
    %33 = vector.shape_cast %30 : vector<16x128xf32> to vector<1x16x128xf32>
    tpu.vector_store %arg7[%c0_16, %c0_17, %c0_18], %33 {strides = array<i32>} : memref<1x16x128xf32, #tpu.memory_space<vmem>>, vector<1x16x128xf32>,
    %cst_19 = arith.constant dense<0.000000e+00> : vector<16xf32>
    %34 = vector.multi_reduction <add>, %30, %cst_19 [1] : vector<16x128xf32> to vector<16xf32>
    %35 = vector.shape_cast %34 : vector<16xf32> to vector<16x1xf32>
    %36 = arith.mulf %30, %30 : vector<16x128xf32>
    %cst_20 = arith.constant dense<0.000000e+00> : vector<16xf32>
    %37 = vector.multi_reduction <add>, %36, %cst_20 [1] : vector<16x128xf32> to vector<16xf32>
    %38 = vector.shape_cast %37 : vector<16xf32> to vector<16x1xf32>
    %39 = tpu.concatenate %35, %38 in 1 : vector<16x1xf32>, vector<16x1xf32> -> vector<16x2xf32>
    %c0_21 = arith.constant 0 : index
    %c0_22 = arith.constant 0 : index
    %c0_23 = arith.constant 0 : index
    %40 = vector.load %arg8[%c0_21, %c0_22, %c0_23] : memref<1x16x2xf32, #tpu.memory_space<vmem>>, vector<1x16x2xf32>
    %41 = vector.shape_cast %40 : vector<1x16x2xf32> to vector<16x2xf32>
    %42 = vector.shape_cast %39 : vector<16x2xf32> to vector<1x16x2xf32>
    tpu.vector_store %arg8[%c0_21, %c0_22, %c0_23], %42 {strides = array<i32>} : memref<1x16x2xf32, #tpu.memory_space<vmem>>, vector<1x16x2xf32>,
    return
  }
  func.func @transform_0(%arg0: i32) -> (i32, i32, i32) {
    %c0_i32 = arith.constant 0 : i32
    %c0_i32_0 = arith.constant 0 : i32
    %c0_i32_1 = arith.constant 0 : i32
    return %arg0, %c0_i32, %c0_i32_0 : i32, i32, i32
  }
  func.func @transform_1(%arg0: i32) -> (i32, i32, i32) {
    %c0_i32 = arith.constant 0 : i32
    %c0_i32_0 = arith.constant 0 : i32
    %c0_i32_1 = arith.constant 0 : i32
    return %arg0, %c0_i32, %c0_i32_0 : i32, i32, i32
  }
  func.func @transform_2(%arg0: i32) -> (i32, i32) {
    %c0_i32 = arith.constant 0 : i32
    %c0_i32_0 = arith.constant 0 : i32
    %c0_i32_1 = arith.constant 0 : i32
    return %c0_i32, %c0_i32_0 : i32, i32
  }
  func.func @transform_3(%arg0: i32) -> (i32, i32) {
    %c0_i32 = arith.constant 0 : i32
    %c0_i32_0 = arith.constant 0 : i32
    %c0_i32_1 = arith.constant 0 : i32
    return %c0_i32, %c0_i32_0 : i32, i32
  }
  func.func @transform_4(%arg0: i32) -> (i32, i32) {
    %c0_i32 = arith.constant 0 : i32
    %c0_i32_0 = arith.constant 0 : i32
    %c0_i32_1 = arith.constant 0 : i32
    return %c0_i32, %c0_i32_0 : i32, i32
  }
  func.func @transform_5(%arg0: i32) -> (i32, i32) {
    %c0_i32 = arith.constant 0 : i32
    %c0_i32_0 = arith.constant 0 : i32
    %c0_i32_1 = arith.constant 0 : i32
    return %c0_i32, %c0_i32_0 : i32, i32
  }
  func.func @transform_6(%arg0: i32) -> (i32, i32, i32) {
    %c0_i32 = arith.constant 0 : i32
    %c0_i32_0 = arith.constant 0 : i32
    %c0_i32_1 = arith.constant 0 : i32
    return %arg0, %c0_i32, %c0_i32_0 : i32, i32, i32
  }
  func.func @transform_7(%arg0: i32) -> (i32, i32, i32) {
    %c0_i32 = arith.constant 0 : i32
    %c0_i32_0 = arith.constant 0 : i32
    %c0_i32_1 = arith.constant 0 : i32
    return %arg0, %c0_i32, %c0_i32_0 : i32, i32, i32
  }
}

module attributes {stable_mosaic.version = 11 : i64} {
  func.func @_bn2_residual_kernel(%arg0: i32, %arg1: memref<1x16x128xf32, #tpu.memory_space<vmem>>, %arg2: memref<1x16x128xf32, #tpu.memory_space<vmem>>, %arg3: memref<16x1xf32, #tpu.memory_space<vmem>>, %arg4: memref<16x1xf32, #tpu.memory_space<vmem>>, %arg5: memref<1x16x128xf32, #tpu.memory_space<vmem>>) attributes {dimension_semantics = [#tpu.dimension_semantics<parallel>], iteration_bounds = array<i64: 2>, scalar_prefetch = 0 : i64, scratch_operands = 0 : i64, tpu.core_type = #tpu.core_type<tc>, window_params = [{transform_indices = @transform_0, window_bounds = array<i64: 1, 16, 128>}, {transform_indices = @transform_1, window_bounds = array<i64: 1, 16, 128>}, {pipeline_mode = #tpu.pipeline_mode<synchronous>, transform_indices = @transform_2, window_bounds = array<i64: 16, 1>}, {pipeline_mode = #tpu.pipeline_mode<synchronous>, transform_indices = @transform_3, window_bounds = array<i64: 16, 1>}, {transform_indices = @transform_4, window_bounds = array<i64: 1, 16, 128>}]} {
    %c0 = arith.constant 0 : index
    %c0_0 = arith.constant 0 : index
    %c0_1 = arith.constant 0 : index
    %0 = vector.load %arg1[%c0, %c0_0, %c0_1] : memref<1x16x128xf32, #tpu.memory_space<vmem>>, vector<1x16x128xf32>
    %1 = vector.shape_cast %0 : vector<1x16x128xf32> to vector<16x128xf32>
    %c0_2 = arith.constant 0 : index
    %c0_3 = arith.constant 0 : index
    %2 = vector.load %arg3[%c0_2, %c0_3] : memref<16x1xf32, #tpu.memory_space<vmem>>, vector<16x1xf32>
    %3 = vector.broadcast %2 : vector<16x1xf32> to vector<16x128xf32>
    %4 = arith.mulf %1, %3 : vector<16x128xf32>
    %c0_4 = arith.constant 0 : index
    %c0_5 = arith.constant 0 : index
    %5 = vector.load %arg4[%c0_4, %c0_5] : memref<16x1xf32, #tpu.memory_space<vmem>>, vector<16x1xf32>
    %6 = vector.broadcast %5 : vector<16x1xf32> to vector<16x128xf32>
    %7 = arith.addf %4, %6 : vector<16x128xf32>
    %c0_6 = arith.constant 0 : index
    %c0_7 = arith.constant 0 : index
    %c0_8 = arith.constant 0 : index
    %8 = vector.load %arg2[%c0_6, %c0_7, %c0_8] : memref<1x16x128xf32, #tpu.memory_space<vmem>>, vector<1x16x128xf32>
    %9 = vector.shape_cast %8 : vector<1x16x128xf32> to vector<16x128xf32>
    %10 = arith.addf %7, %9 : vector<16x128xf32>
    %cst = arith.constant 0.000000e+00 : f32
    %11 = vector.broadcast %cst : f32 to vector<16x128xf32>
    %12 = arith.maximumf %10, %11 : vector<16x128xf32>
    %c0_9 = arith.constant 0 : index
    %c0_10 = arith.constant 0 : index
    %c0_11 = arith.constant 0 : index
    %13 = vector.load %arg5[%c0_9, %c0_10, %c0_11] : memref<1x16x128xf32, #tpu.memory_space<vmem>>, vector<1x16x128xf32>
    %14 = vector.shape_cast %13 : vector<1x16x128xf32> to vector<16x128xf32>
    %15 = vector.shape_cast %12 : vector<16x128xf32> to vector<1x16x128xf32>
    tpu.vector_store %arg5[%c0_9, %c0_10, %c0_11], %15 {strides = array<i32>} : memref<1x16x128xf32, #tpu.memory_space<vmem>>, vector<1x16x128xf32>,
    return
  }
  func.func @transform_0(%arg0: i32) -> (i32, i32, i32) {
    %c0_i32 = arith.constant 0 : i32
    %c0_i32_0 = arith.constant 0 : i32
    %c0_i32_1 = arith.constant 0 : i32
    return %arg0, %c0_i32, %c0_i32_0 : i32, i32, i32
  }
  func.func @transform_1(%arg0: i32) -> (i32, i32, i32) {
    %c0_i32 = arith.constant 0 : i32
    %c0_i32_0 = arith.constant 0 : i32
    %c0_i32_1 = arith.constant 0 : i32
    return %arg0, %c0_i32, %c0_i32_0 : i32, i32, i32
  }
  func.func @transform_2(%arg0: i32) -> (i32, i32) {
    %c0_i32 = arith.constant 0 : i32
    %c0_i32_0 = arith.constant 0 : i32
    %c0_i32_1 = arith.constant 0 : i32
    return %c0_i32, %c0_i32_0 : i32, i32
  }
  func.func @transform_3(%arg0: i32) -> (i32, i32) {
    %c0_i32 = arith.constant 0 : i32
    %c0_i32_0 = arith.constant 0 : i32
    %c0_i32_1 = arith.constant 0 : i32
    return %c0_i32, %c0_i32_0 : i32, i32
  }
  func.func @transform_4(%arg0: i32) -> (i32, i32, i32) {
    %c0_i32 = arith.constant 0 : i32
    %c0_i32_0 = arith.constant 0 : i32
    %c0_i32_1 = arith.constant 0 : i32
    return %arg0, %c0_i32, %c0_i32_0 : i32, i32, i32
  }
}

</mosaic_0001>

<bundles_post_ra>
// kernel: complex_resnet_block_forward.5
= control target key start
LH: loop header
LB: loop body
LE: loop exit
PB: predicated region body
PF: predicated region fallthrough
CT: control target
= control target key end

     0   :  { %s384_s15 = smov 0   ;;  %s416_s0 = inlined_call_operand.vmem [shape: f32[2,16,128], index: 0, kind: input, shape index: {}]   ;;  %s417_s1 = inlined_call_operand.vmem [shape: f32[2,16,128], index: 1, kind: input, shape index: {}]   ;;  %s418_s2 = inlined_call_operand.vmem [shape: f32[16,1], index: 2, kind: input, shape index: {}]   ;;  %s419_s3 = inlined_call_operand.vmem [shape: f32[16,1], index: 3, kind: input, shape index: {}]   ;;  %s420_s4 = inlined_call_operand.vmem [shape: f32[2,16,128], index: 4, kind: output, shape index: {}]  }
   0x1 LB: > { %s323_s16 = sadd.s32 4294967295, %s356_s15   ;;  %p327_p0 = scmp.ge.s32.totalorder %s356_s15, 1  ;;  %s356_s15 = sphi %s384_s15, %s14_s15  }
   0x2   : > { %p172_p1 = scmp.lt.s32.totalorder %s356_s15, 3 }
   0x4   : > { %p173_p2 = pnand %p327_p0, %p172_p1 }
   0x5   : > { %v234_v0 = vld [vmem:[%s419_s3] sm:$0xff] (!%p173_p2)  ;;  %v358_v2 = vmov (!%p173_p2), 0   ;;  %v235_v3 = vld [vmem:[%s419_s3 + $0x8] sm:$0xff] (!%p173_p2)  ;;  %p203_p3 = scmp.lt.s32.totalorder (!%p173_p2), %s323_s16, 1 }
   0x6   : > { %176 = sbr.rel (%p173_p2) target bundleno = 148 (0x94), region = 36  ;;  %v220_v1 = vld [vmem:[%s418_s2] sm:$0xff] (!%p173_p2)  ;;  %349 = vset.pattern.permute.xlu1 (!%p173_p2), %v358_v2  ;;  %348 = vset.pattern.permute.xlu0 (!%p173_p2), %v358_v2  ;;  %v221_v4 = vld [vmem:[%s418_s2 + $0x8] sm:$0xff] (!%p173_p2) }
   0x7   : > { %238 = vperm.xlu1 (!%p173_p2), %349, %v234_v0   ;;  %224 = vperm.xlu0 (!%p173_p2), %348, %v220_v1  }
   0xb   : > { %243 = vperm.xlu1 (!%p173_p2), %349, %v235_v3   ;;  %229 = vperm.xlu0 (!%p173_p2), %348, %v221_v4  }
   0xd   : > { %s422_s16 = smov (!%p203_p3, %s323_s16), 1 }
   0xe   : > { %s336_s25 = sshll.u32 %s422_s16, 4 }
   0xf   : > { %s207_s28 = scalar_lea.vmem %s416_s0, %s336_s25  ;;  %s212_s5 = scalar_lea.vmem %s417_s1, %s336_s25 }
  0x10   : > { %v218_v5 = vld [vmem:[%s207_s28] sm:$0xff]  ;;  %v219_v10 = vld [vmem:[%s207_s28 + $0x8] sm:$0xff]  ;;  %s217_s8 = scalar_lea.vmem %s420_s4, %s336_s25 }
  0x11   : > { %v248_v9 = vld [vmem:[%s212_s5] sm:$0xff]  ;;  %v249_v16 = vld [vmem:[%s212_s5 + $0x8] sm:$0xff] }
  0x86   : > { %v239_v6 = vpop.permute.xlu1 %238  ;;  %v225_v7 = vpop.permute.xlu0 %224 }
  0x87   : > { %v232_v8 = vmul.f32 %v225_v7, %v218_v5 }
  0x89   : > { %v246_v11 = vadd.f32 %v239_v6, %v232_v8 }
  0x8a   : > { %v230_v12 = vpop.permute.xlu0 %229  ;;  %v244_v15 = vpop.permute.xlu1 %243 }
  0x8b   : > { %v250_v13 = vadd.f32 %v248_v9, %v246_v11  ;;  %v233_v14 = vmul.f32 %v230_v12, %v219_v10 }
  0x8d   : > { %v252_v17 = vmax.f32 %v250_v13, 0.0  ;;  %v247_v18 = vadd.f32 %v244_v15, %v233_v14 }
  0x8f   : > { %254 = vst [vmem:[%s217_s8] sm:$0xff] %v252_v17  ;;  %v251_v19 = vadd.f32 %v249_v16, %v247_v18 }
  0x91   : > { %v253_v20 = vmax.f32 %v251_v19, 0.0 }
  0x93   : > { %255 = vst [vmem:[%s217_s8 + $0x8] sm:$0xff] %v253_v20 }
  0x94 PF: > { %s14_s15 = sadd.s32 1, %s356_s15  }
  0x95   : > { %p11_p4 = scmp.ge.s32.totalorder %s14_s15, 4  }
  0x97   :  { %13 = sbr.rel (!%p11_p4) target bundleno = 1 (0x1), region = 69 }

// kernel: complex_resnet_block_forward.3
= control target key start
LH: loop header
LB: loop body
LE: loop exit
PB: predicated region body
PF: predicated region fallthrough
CT: control target
= control target key end

     0   :  { %s911_s27 = smov 0   ;;  %s976_s0 = inlined_call_operand.vmem [shape: bf16[2,8,144], index: 0, kind: input, shape index: {}]   ;;  %s977_s1 = inlined_call_operand.vmem [shape: bf16[2,8,144], index: 1, kind: input, shape index: {}]   ;;  %s978_s2 = inlined_call_operand.vmem [shape: bf16[32,24], index: 2, kind: input, shape index: {}]   ;;  %s979_s3 = inlined_call_operand.vmem [shape: f32[16,1], index: 3, kind: input, shape index: {}]   ;;  %s980_s4 = inlined_call_operand.vmem [shape: f32[16,1], index: 4, kind: input, shape index: {}]   ;;  %s981_s5 = inlined_call_operand.vmem [shape: bf16[2,16,128], index: 5, kind: output, shape index: {0}]   ;;  %s982_s6 = inlined_call_operand.vmem [shape: bf16[2,16,128], index: 6, kind: output, shape index: {1}]   ;;  %s983_s7 = inlined_call_operand.vmem [shape: f32[2,16,128], index: 7, kind: output, shape index: {2}]   ;;  %s984_s8 = inlined_call_operand.vmem [shape: f32[2,16,2], index: 8, kind: output, shape index: {3}]  }
   0x1 LB: > { %s758_s28 = sadd.s32 4294967295, %s860_s27   ;;  %p762_p0 = scmp.ge.s32.totalorder %s860_s27, 1  ;;  %s860_s27 = sphi %s911_s27, %s19_s27  }
   0x2   : > { %p279_p1 = scmp.lt.s32.totalorder %s860_s27, 3 }
   0x4   : > { %p280_p2 = pnand %p762_p0, %p279_p1 }
   0x5   : > { %p333_p3 = scmp.lt.s32.totalorder (!%p280_p2), %s758_s28, 1  ;;  %v862_v0 = vmov (!%p280_p2), 0.0   ;;  %v852_v1 = vld [vmem:[%s978_s2] sm:$0xff] (!%p280_p2)   ;;  %vm399_vm0 = vcmask (!%p280_p2), 195584   ;;  %vm384_vm1 = vcmask (!%p280_p2), 1043456   ;;  %vm863_vm2 = vmmov (!%p280_p2), 0  }
   0x6   : > { %283 = sbr.rel (%p280_p2) target bundleno = 525 (0x20d), region = 40  ;;  %825 = vmatprep.subr.bf16.mxu1 (!%p280_p2), %v862_v0  ;;  %821 = vmatprep.mubr.msk.bf16.mxu0 (!%p280_p2), %vm399_vm0, %v852_v1  ;;  %s864_s16 = smov (!%p280_p2), 112   ;;  %v865_v9 = vmov (!%p280_p2), 0   ;;  %v458_v10 = vld [vmem:[%s979_s3] sm:$0xff] (!%p280_p2)  ;;  %v459_v11 = vld [vmem:[%s979_s3 + $0x8] sm:$0xff] (!%p280_p2)  ;;  %vm382_vm3 = vcmask (!%p280_p2), 916480  }
   0x7   : > { %829 = vmatprep.mubr.msk.bf16.mxu1 (!%p280_p2), %vm863_vm2, %v862_v0  ;;  %846 = vset.pattern.permute.xlu0 (!%p280_p2), %v865_v9  ;;  %v853_v20 = vld [vmem:[%s978_s2 + $0x8] sm:$0xff] (!%p280_p2)   ;;  %v472_v43 = vld [vmem:[%s980_s4] sm:$0xff] (!%p280_p2)  ;;  %vm586_vm4 = vcmask (!%p280_p2), 7168   ;;  %vm589_vm5 = vcmask (!%p280_p2), 15360  }
   0x8   : > { %847 = vset.pattern.permute.xlu1 (!%p280_p2), %v865_v9  ;;  %v473_v42 = vld [vmem:[%s980_s4 + $0x8] sm:$0xff] (!%p280_p2) }
   0xd   : > { %s986_s28 = smov (!%p333_p3, %s758_s28), 1 }
   0xe   : > { %s925_s9 = sshll.u32 %s986_s28, 3 }
   0xf   : > { %s337_s12 = scalar_lea.vmem %s976_s0, %s925_s9  ;;  %s342_s15 = scalar_lea.vmem %s977_s1, %s925_s9 }
  0x10   : > { %v364_v2 = vld [vmem:[%s337_s12] sm:$0xff]  ;;  %s347_s25 = scalar_lea.vmem %s981_s5, %s925_s9  ;;  %s352_s30 = scalar_lea.vmem %s982_s6, %s925_s9 }
  0x11   : > { %v365_v3 = vld [vmem:[%s342_s15] sm:$0xff]  ;;  %v776_v4 = vcombine.low %v364_v2, %v364_v2  ;;  %v777_v6 = vcombine.high %v364_v2, %v364_v2  ;;  %s794_s9 = sshll.u32 %s986_s28, 4 }
  0x12   : > { %v775_v5 = vcombine.low %v365_v3, %v365_v3  ;;  %v782_v7 = vcombine.high %v365_v3, %v365_v3  ;;  %s357_s19 = scalar_lea.vmem %s983_s7, %s794_s9 }
  0x13   : > { %378 = vrot.lane.b32.xlu0 %v776_v4, %s864_s16 }
  0x14   : > { %488 = vrot.lane.b32.xlu1 %v775_v5, %s864_s16  ;;  %v387_v8 = vsel %vm384_vm1, %v364_v2, %v775_v5 }
  0x15   : > { %817 = vmatprep.subr.bf16.mxu0 %v387_v8 }
  0x16   : > { %818 = vmatpush3.bf16.msra.mxu0 %v387_v8 }
  0x17   : > { %380 = vrot.lane.b32.xlu0 %v777_v6, %s864_s16 }
  0x18   : > { %490 = vrot.lane.b32.xlu1 %v782_v7, %s864_s16  ;;  %s362_s16 = scalar_lea.vmem %s984_s8, %s794_s9 }
  0x1b   : > { %462 = vperm.xlu0 %846, %v458_v10  }
  0x1c   : > { %467 = vperm.xlu1 %847, %v459_v11  }
  0x85   : > { %v379_v12 = vpop.permute.xlu0 %378 }
  0x86   : > { %v489_v13 = vpop.permute.xlu1 %488 }
  0x89   : > { %v381_v14 = vpop.permute.xlu0 %380 }
  0x8a   : > { %v491_v15 = vpop.permute.xlu1 %490  ;;  %v383_v16 = vsel %vm382_vm3, %v379_v12, %v381_v14 }
  0x8b   : > { %v492_v17 = vsel %vm382_vm3, %v489_v13, %v491_v15  ;;  %833 = vmatprep.subr.msk.bf16.mxu0 %vm384_vm1, %v383_v16  ;;  %v407_v18 = vsel %vm384_vm1, %v383_v16, 0  ;;  %v494_v19 = vsel %vm384_vm1, %v365_v3, %v383_v16 }
  0x8c   : > { %820 = vmatpush3.bf16.msra.mxu0 %v407_v18  ;;  %826 = vmatpush3.bf16.msra.mxu1 %v494_v19  ;;  %v497_v21 = vsel %vm384_vm1, %v492_v17, 0 }
  0x8d   : > { %827 = vmatprep.subr.bf16.mxu1 %v862_v0 }
  0x8f   : > { %822 = vmatmul.mubr.msk.bf16.vlgmr.msra.gmra.mrb[0].mxu0 %vm399_vm0, %v853_v20 }
  0x90   : > { %828 = vmatpush3.bf16.msra.mxu1 %v497_v21 }
  0x93   : > { %830 = vmatmul.mubr.msk.bf16.vlgmr.msra.gmra.mrb[0].mxu1 %vm399_vm0, %v852_v1 }
  0x9a   : > { %v463_v22 = vpop.permute.xlu0 %462 }
  0x9b   : > { %v468_v25 = vpop.permute.xlu1 %467 }
 0x162   : > { %v823_v23 = vpop.f32.mrb[0].mxu0 }
 0x163   : > { %v443_v24 = vpop.f32.mrb[1].mxu0 }
 0x164   : > { %v470_v26 = vadd.f32 %v463_v22, %v443_v24  ;;  %v824_v27 = vpop.f32.mrb[2].mxu0 }
 0x165   : > { %v446_v28 = vpop.f32.mrb[3].mxu0 }
 0x166   : > { %v471_v29 = vadd.f32 %v468_v25, %v446_v28  ;;  %v533_v30 = vpop.f32.mrb[0].mxu1  ;;  %562 = vadd.xlane.f32.xlu1 %v470_v26  ;;  %v572_v38 = vmul.f32 %v470_v26, %v470_v26 }
 0x167   : > { %v534_v31 = vadd.f32 %v533_v30, %v463_v22  ;;  %v831_v32 = vpop.f32.mrb[1].mxu1 }
 0x168   : > { %v803_v33 = vpack.c.bf16 %v471_v29, %v470_v26  ;;  %v536_v34 = vpop.f32.mrb[2].mxu1  ;;  %564 = vadd.xlane.f32.xlu0 %v471_v29  ;;  %v573_v35 = vmul.f32 %v471_v29, %v471_v29 }
 0x169   : > { %v537_v36 = vadd.f32 %v536_v34, %v468_v25  ;;  %v832_v37 = vpop.f32.mrb[3].mxu1  ;;  %v578_v41 = vmul.f32 %v534_v31, %v534_v31 }
 0x16a   : > { %804 = vst [vmem:[%s347_s25] sm:$0xff] %v803_v33   ;;  %576 = vadd.xlane.f32.xlu1 %v573_v35 }
 0x16b   : > { %v808_v39 = vpack.c.bf16 %v537_v36, %v534_v31  ;;  %v579_v40 = vmul.f32 %v537_v36, %v537_v36 }
 0x16c   : > { %574 = vadd.xlane.f32.xlu0 %v572_v38 }
 0x16d   : > { %809 = vst [vmem:[%s352_s30] sm:$0xff] %v808_v39  }
 0x16e   : > { %568 = vadd.xlane.f32.xlu1 %v537_v36 }
 0x170   : > { %566 = vadd.xlane.f32.xlu0 %v534_v31 }
 0x172   : > { %582 = vadd.xlane.f32.xlu1 %v579_v40 }
 0x174   : > { %580 = vadd.xlane.f32.xlu0 %v578_v41 }
 0x183   : > { %481 = vperm.xlu1 %847, %v473_v42  }
 0x18a   : > { %476 = vperm.xlu0 %846, %v472_v43  }
 0x1f3   : > { %v563_v44 = vpop.xlane.xlu1 %562 }
 0x1f5   : > { %v565_v45 = vpop.xlane.xlu0 %564 }
 0x1f7   : > { %v577_v46 = vpop.xlane.xlu1 %576 }
 0x1f9   : > { %v575_v47 = vpop.xlane.xlu0 %574 }
 0x1fb   : > { %v569_v48 = vpop.xlane.xlu1 %568 }
 0x1fc   : > { %v571_v51 = vadd.f32 %v569_v48, %v565_v45 }
 0x1fd   : > { %v567_v49 = vpop.xlane.xlu0 %566 }
 0x1fe   : > { %v570_v54 = vadd.f32 %v567_v49, %v563_v44 }
 0x1ff   : > { %v583_v50 = vpop.xlane.xlu1 %582 }
 0x200   : > { %v585_v52 = vadd.f32 %v583_v50, %v577_v46 }
 0x201   : > { %v581_v53 = vpop.xlane.xlu0 %580 }
 0x202   : > { %v588_v55 = vsel %vm586_vm4, %v571_v51, %v585_v52  ;;  %v584_v56 = vadd.f32 %v581_v53, %v575_v47 }
 0x203   : > { %v482_v57 = vpop.permute.xlu1 %481  ;;  %591 = vst.msk [vmem:[%s362_s16 + $0x8] sm:$0xff] %vm589_vm5, %v588_v55 }
 0x204   : > { %v587_v58 = vsel %vm586_vm4, %v570_v54, %v584_v56  ;;  %v485_v59 = vadd.f32 %v824_v27, %v482_v57 }
 0x205   : > { %590 = vst.msk [vmem:[%s362_s16] sm:$0xff] %vm589_vm5, %v587_v58 }
 0x206   : > { %561 = vst [vmem:[%s357_s19 + $0x8] sm:$0xff] %v485_v59 }
 0x209   : > { %v477_v60 = vpop.permute.xlu0 %476 }
 0x20a   : > { %v484_v61 = vadd.f32 %v823_v23, %v477_v60 }
 0x20c   : > { %560 = vst [vmem:[%s357_s19] sm:$0xff] %v484_v61 }
 0x20d PF: > { %s19_s27 = sadd.s32 1, %s860_s27  }
 0x20e   : > { %p16_p4 = scmp.ge.s32.totalorder %s19_s27, 4  }
 0x210   :  { %18 = sbr.rel (!%p16_p4) target bundleno = 1 (0x1), region = 109 }

// kernel: complex_resnet_block_forward.4
= control target key start
LH: loop header
LB: loop body
LE: loop exit
PB: predicated region body
PF: predicated region fallthrough
CT: control target
= control target key end

     0   :  { %s661_s24 = smov 0   ;;  %s709_s0 = inlined_call_operand.vmem [shape: bf16[2,16,128], index: 0, kind: input, shape index: {}]   ;;  %s710_s1 = inlined_call_operand.vmem [shape: bf16[2,16,128], index: 1, kind: input, shape index: {}]   ;;  %s711_s2 = inlined_call_operand.vmem [shape: f32[16,1], index: 2, kind: input, shape index: {}]   ;;  %s712_s3 = inlined_call_operand.vmem [shape: f32[16,1], index: 3, kind: input, shape index: {}]   ;;  %s713_s4 = inlined_call_operand.vmem [shape: bf16[16,48], index: 4, kind: input, shape index: {}]   ;;  %s714_s5 = inlined_call_operand.vmem [shape: f32[16,1], index: 5, kind: input, shape index: {}]   ;;  %s715_s6 = inlined_call_operand.vmem [shape: f32[2,16,128], index: 6, kind: output, shape index: {0}]   ;;  %s716_s7 = inlined_call_operand.vmem [shape: f32[2,16,2], index: 7, kind: output, shape index: {1}]  }
   0x1 LB: > { %s549_s25 = sadd.s32 4294967295, %s615_s24   ;;  %p553_p0 = scmp.ge.s32.totalorder %s615_s24, 1  ;;  %s615_s24 = sphi %s661_s24, %s18_s24  }
   0x2   : > { %p250_p1 = scmp.lt.s32.totalorder %s615_s24, 3 }
   0x4   : > { %p251_p2 = pnand %p553_p0, %p250_p1 }
   0x5   : > { %v315_v0 = vld [vmem:[%s712_s3] sm:$0xff] (!%p251_p2)  ;;  %v617_v2 = vmov (!%p251_p2), 0   ;;  %v316_v3 = vld [vmem:[%s712_s3 + $0x8] sm:$0xff] (!%p251_p2)  ;;  %v618_v6 = vmov (!%p251_p2), 0.0   ;;  %p292_p3 = scmp.lt.s32.totalorder (!%p251_p2), %s549_s25, 1  ;;  %vm619_vm0 = vmmov (!%p251_p2), 0  }
   0x6   : > { %254 = sbr.rel (%p251_p2) target bundleno = 637 (0x27d), region = 44  ;;  %v313_v1 = vld [vmem:[%s711_s2] sm:$0xff] (!%p251_p2)  ;;  %607 = vset.pattern.permute.xlu1 (!%p251_p2), %v617_v2  ;;  %606 = vset.pattern.permute.xlu0 (!%p251_p2), %v617_v2  ;;  %v314_v4 = vld [vmem:[%s711_s2 + $0x8] sm:$0xff] (!%p251_p2)  ;;  %s620_s20 = smov (!%p251_p2), 16   ;;  %vm362_vm1 = vcmask (!%p251_p2), 130048   ;;  %vm386_vm3 = vcmask (!%p251_p2), 392192  }
   0x7   : > { %335 = vperm.xlu1 (!%p251_p2), %607, %v315_v0   ;;  %323 = vperm.xlu0 (!%p251_p2), %606, %v313_v1   ;;  %v369_v5 = vld [vmem:[%s714_s5] sm:$0xff] (!%p251_p2)  ;;  %v370_v31 = vld [vmem:[%s714_s5 + $0x8] sm:$0xff] (!%p251_p2)  ;;  %vm563_vm2 = vmneg (!%p251_p2), %vm362_vm1  ;;  %vm443_vm4 = vcmask (!%p251_p2), 7168   ;;  %vm446_vm5 = vcmask (!%p251_p2), 15360  }
   0x8   : > { %584 = vmatprep.subr.bf16.mxu0 (!%p251_p2), %v618_v6  ;;  %590 = vmatprep.mubr.msk.bf16.mxu0 (!%p251_p2), %vm619_vm0, %v618_v6  ;;  %v608_v33 = vld [vmem:[%s713_s4] sm:$0xff] (!%p251_p2)  }
   0xb   : > { %340 = vperm.xlu1 (!%p251_p2), %607, %v316_v3   ;;  %328 = vperm.xlu0 (!%p251_p2), %606, %v314_v4  }
   0xd   : > { %s718_s25 = smov (!%p292_p3, %s549_s25), 1 }
   0xe   : > { %s568_s13 = sshll.u32 %s718_s25, 3  ;;  %s570_s27 = sshll.u32 %s718_s25, 4 }
   0xf   : > { %373 = vperm.xlu1 %607, %v369_v5   ;;  %s296_s16 = scalar_lea.vmem %s709_s0, %s568_s13  ;;  %s301_s19 = scalar_lea.vmem %s710_s1, %s568_s13 }
  0x10   : > { %v573_v7 = vld [vmem:[%s296_s16] sm:$0xff]   ;;  %s306_s30 = scalar_lea.vmem %s715_s6, %s570_s27  ;;  %s311_s9 = scalar_lea.vmem %s716_s7, %s570_s27 }
  0x11   : > { %v577_v8 = vld [vmem:[%s301_s19] sm:$0xff]   ;;  %v574_v9 = vunpack.c.l.bf16 %v573_v7  ;;  %v575_v15 = vunpack.c.h.bf16 %v573_v7 }
  0x12   : > { %v578_v10 = vunpack.c.l.bf16 %v577_v8  ;;  %v579_v16 = vunpack.c.h.bf16 %v577_v8 }
  0x86   : > { %v336_v11 = vpop.permute.xlu1 %335  ;;  %v324_v12 = vpop.permute.xlu0 %323 }
  0x87   : > { %v331_v13 = vmul.f32 %v574_v9, %v324_v12  ;;  %v351_v14 = vmul.f32 %v578_v10, %v324_v12 }
  0x89   : > { %v343_v17 = vadd.f32 %v336_v11, %v331_v13  ;;  %v353_v19 = vadd.f32 %v351_v14, %v336_v11 }
  0x8a   : > { %v329_v18 = vpop.permute.xlu0 %328  ;;  %v341_v22 = vpop.permute.xlu1 %340 }
  0x8b   : > { %v332_v20 = vmul.f32 %v575_v15, %v329_v18  ;;  %v352_v21 = vmul.f32 %v579_v16, %v329_v18  ;;  %v345_v25 = vmax.f32 %v343_v17, 0.0  ;;  %v355_v26 = vmax.f32 %v353_v19, 0.0 }
  0x8d   : > { %v344_v23 = vadd.f32 %v341_v22, %v332_v20  ;;  %v354_v24 = vadd.f32 %v352_v21, %v341_v22 }
  0x8e   : > { %v374_v34 = vpop.permute.xlu1 %373 }
  0x8f   : > { %v346_v27 = vmax.f32 %v344_v23, 0.0  ;;  %v356_v28 = vmax.f32 %v354_v24, 0.0 }
  0x91   : > { %v358_v29 = vpack.c.bf16 %v356_v28, %v355_v26  ;;  %v357_v30 = vpack.c.bf16 %v346_v27, %v345_v25 }
  0x93   : > { %360 = vrot.lane.b32.xlu0 %v358_v29, %s620_s20 }
  0x97   : > { %378 = vperm.xlu0 %606, %v370_v31  }
 0x105   : > { %v361_v32 = vpop.permute.xlu0 %360 }
 0x106   : > { %585 = vmatpush3.bf16.msk.msra.mxu0 %vm563_vm2, %v361_v32 }
 0x107   : > { %586 = vmatprep.subr.bf16.mxu0 %v618_v6 }
 0x10a   : > { %587 = vmatpush3.bf16.msra.mxu0 %v357_v30 }
 0x10b   : > { %588 = vmatprep.subr.bf16.mxu0 %v618_v6 }
 0x10e   : > { %589 = vmatpush3.bf16.msra.mxu0 %v358_v29 }
 0x111   : > { %591 = vmatmul.mubr.msk.bf16.vlgmr.msra.gmra.mrb[0].mxu0 %vm386_vm3, %v608_v33 }
 0x116   : > { %v379_v38 = vpop.permute.xlu0 %378 }
 0x1e4   : > { %v424_v35 = vpop.f32.mrb[0].mxu0 }
 0x1e5   : > { %v425_v36 = vadd.f32 %v424_v35, %v374_v34  ;;  %v592_v37 = vpop.f32.mrb[1].mxu0 }
 0x1e6   : > { %v427_v39 = vpop.f32.mrb[2].mxu0 }
 0x1e7   : > { %431 = vst [vmem:[%s306_s30] sm:$0xff] %v425_v36  ;;  %v428_v40 = vadd.f32 %v427_v39, %v379_v38  ;;  %433 = vadd.xlane.f32.xlu1 %v425_v36  ;;  %v593_v41 = vpop.f32.mrb[3].mxu0  ;;  %v437_v43 = vmul.f32 %v425_v36, %v425_v36 }
 0x1e9   : > { %432 = vst [vmem:[%s306_s30 + $0x8] sm:$0xff] %v428_v40  ;;  %435 = vadd.xlane.f32.xlu0 %v428_v40  ;;  %v438_v42 = vmul.f32 %v428_v40, %v428_v40 }
 0x1eb   : > { %441 = vadd.xlane.f32.xlu1 %v438_v42 }
 0x1ed   : > { %439 = vadd.xlane.f32.xlu0 %v437_v43 }
 0x274   : > { %v434_v44 = vpop.xlane.xlu1 %433 }
 0x276   : > { %v436_v45 = vpop.xlane.xlu0 %435 }
 0x278   : > { %v442_v46 = vpop.xlane.xlu1 %441 }
 0x279   : > { %v445_v47 = vsel %vm443_vm4, %v436_v45, %v442_v46 }
 0x27a   : > { %448 = vst.msk [vmem:[%s311_s9 + $0x8] sm:$0xff] %vm446_vm5, %v445_v47  ;;  %v440_v48 = vpop.xlane.xlu0 %439 }
 0x27b   : > { %v444_v49 = vsel %vm443_vm4, %v434_v44, %v440_v48 }
 0x27c   : > { %447 = vst.msk [vmem:[%s311_s9] sm:$0xff] %vm446_vm5, %v444_v49 }
 0x27d PF: > { %s18_s24 = sadd.s32 1, %s615_s24  }
 0x27e   : > { %p15_p4 = scmp.ge.s32.totalorder %s18_s24, 4  }
 0x280   :  { %17 = sbr.rel (!%p15_p4) target bundleno = 1 (0x1), region = 89 }

</bundles_post_ra>
